<compile_context>
chip_gen: v6e
topology: v6e:2x2x1
jax: 0.10.0
libtpu: 0.0.40
codegen_flags: <defaults>
</compile_context>

<pallas_src>
import functools
import math

import jax
import jax.numpy as jnp
from jax.experimental import pallas as pl
from jax.experimental.pallas import tpu as pltpu

_VMEM_BUDGET_BYTES = 12 << 20   # target double-buffered (x + out) bytes / step
_CHUNK_LANES = 2048             # per-dot lane-width target inside the kernel


# ---------------------------------------------------------------------------
# Kernel: one (batch, row-tile) block of the padded 'same'-width convolution.
# ---------------------------------------------------------------------------
def _spconv_kernel(x_ref, w_ref, b_ref, o_ref, *, kh, kw, w_pad,
                   rows_per_block, chunk_rows, fuse_taps):
    """x_ref: (1, kh, Cin, MT) row-flattened padded input (MT = rows*W_pad)
       w_ref: (kh, N, kw*Cin) if fuse_taps else (kh, kw, N, Cin)
       b_ref: (N, 1) float32
       o_ref: (1, N, MT), same lane axis as the input."""
    bias = b_ref[...]                                   # (N, 1) f32, hoisted
    n_chunks = pl.cdiv(rows_per_block, chunk_rows)
    for s in range(n_chunks):                           # static unroll
        r0 = s * chunk_rows
        cr = min(chunk_rows, rows_per_block - r0)
        lo, cl = r0 * w_pad, cr * w_pad
        acc = None
        for i in range(kh):                             # height taps (kh==1 in MossFormer)
            xi = x_ref[0, i, :, pl.ds(lo, cl)]          # (Cin, cl)
            # kw frequency taps generated in VMEM with an XLU lane rotate.
            # Wrapped lanes only ever land on discarded tail columns because
            # every chunk is made of whole padded rows.
            taps = [xi] + [pltpu.roll(xi, shift=(cl - j) % cl, axis=1)
                           for j in range(1, kw)]
            if fuse_taps:
                xk = jnp.concatenate(taps, axis=0) if kw > 1 else taps[0]
                part = jnp.dot(w_ref[i], xk,            # one K = kw*Cin MXU pass
                               preferred_element_type=jnp.float32)
            else:                                       # sublane-unaligned Cin fallback
                part = None
                for j, tap in enumerate(taps):
                    pj = jnp.dot(w_ref[i, j], tap,
                                 preferred_element_type=jnp.float32)
                    part = pj if part is None else part + pj
            acc = part if acc is None else acc + part
        o_ref[0, :, pl.ds(lo, cl)] = (acc + bias).astype(o_ref.dtype)


# ---------------------------------------------------------------------------
# Wrapper: pad -> fused conv kernel -> drop tail cols -> sub-pixel shuffle.
# ---------------------------------------------------------------------------
def sp_conv_transpose2d(x, weight, bias, r, *, compute_dtype=jnp.bfloat16,
                        out_dtype=None, vmem_budget_bytes=_VMEM_BUDGET_BYTES):
    """SPConvTranspose2d.forward.  x: (B, Cin, H, W), weight: (Cout*r, Cin, kh, kw).

    Default path streams bf16 operands/outputs (f32 accumulation); pass
    compute_dtype=out_dtype=jnp.float32 for exact float32 semantics."""
    B, Cin, H, W = x.shape
    N, Cin_w, kh, kw = weight.shape          # N = out_channels * r
    assert Cin_w == Cin and N % r == 0
    out_dtype = compute_dtype if out_dtype is None else out_dtype

    # ConstantPad2d((1, 1, 0, 0)) pads the last (W) axis only.
    x_pad = jnp.pad(x, ((0, 0), (0, 0), (0, 0), (1, 1)))
    W_pad = W + 2
    Ho, Wo = H - kh + 1, W_pad - kw + 1
    assert Ho >= 1 and Wo >= 1

    cbytes = jnp.dtype(compute_dtype).itemsize
    obytes = jnp.dtype(out_dtype).itemsize

    # ---- tile geometry: whole padded rows, sized by a VMEM byte budget ----
    rt_align = 128 // math.gcd(W_pad, 128)                # rows -> mt % 128 == 0
    lane_bytes = 2 * (kh * Cin * cbytes + N * obytes)     # dbl-buffered x + out
    budget_rows = max(vmem_budget_bytes // (lane_bytes * W_pad), 1)
    want_tiles = 1 if B >= 2 else 2                       # keep both v7x TCs busy
    if budget_rows >= Ho and (want_tiles == 1 or Ho < 2 * rt_align):
        rt = Ho                                           # one full-extent tile / image
    else:
        target = min(budget_rows, pl.cdiv(Ho, want_tiles))
        rt = max(rt_align, (target // rt_align) * rt_align)
        rt = min(rt, Ho)
    mt = rt * W_pad                                       # %128==0 or full lane extent
    num_row_tiles = pl.cdiv(Ho, rt)
    # TODO(synk): for huge/prime W_pad (rt_align*W_pad beyond the VMEM budget)
    # switch to 128-aligned flat lane tiles with a (kw-1)-lane halo fetch.

    chunk_rows = max(1, min(rt, _CHUNK_LANES // max(W_pad, 1)))
    if chunk_rows < rt and rt % rt_align == 0:            # keep chunk offsets aligned
        chunk_rows = max(rt_align, (chunk_rows // rt_align) * rt_align)

    # ---- operand staging (thin XLA glue: pad+cast(+stack) fuse to one copy) --
    if kh == 1:
        xs = x_pad.reshape(B, 1, Cin, H * W_pad)
    else:
        views = [x_pad[:, :, i:i + Ho, :] for i in range(kh)]
        xs = jnp.stack(views, axis=1).reshape(B, kh, Cin, Ho * W_pad)
    xs = xs.astype(compute_dtype)

    sub = 8 * (4 // cbytes)                               # sublane packing granularity
    fuse_taps = (kw == 1) or (Cin % sub == 0)
    if fuse_taps:
        w2 = jnp.transpose(weight, (2, 0, 3, 1)).reshape(kh, N, kw * Cin)
        w_spec = pl.BlockSpec((kh, N, kw * Cin), lambda b, m: (0, 0, 0))
    else:
        w2 = jnp.transpose(weight, (2, 3, 0, 1))          # (kh, kw, N, Cin)
        w_spec = pl.BlockSpec((kh, kw, N, Cin), lambda b, m: (0, 0, 0, 0))
    w2 = w2.astype(compute_dtype)
    b2 = bias.reshape(N, 1).astype(jnp.float32)

    # VMEM limit: double-buffered blocks + headroom (overrides v5e's 16 MiB
    # scoped default, stays within v7x's 64 MiB physical VMEM for sane shapes).
    blk_bytes = (kh * Cin * mt * cbytes + N * mt * obytes + w2.size * cbytes + N * 4)
    vmem_limit = int(min(max(2 * blk_bytes + (8 << 20), 32 << 20), 96 << 20))

    kernel = functools.partial(
        _spconv_kernel, kh=kh, kw=kw, w_pad=W_pad, rows_per_block=rt,
        chunk_rows=chunk_rows, fuse_taps=fuse_taps)

    out_flat = pl.pallas_call(
        kernel,
        out_shape=jax.ShapeDtypeStruct((B, N, Ho * W_pad), out_dtype),
        grid=(B, num_row_tiles),
        in_specs=[
            pl.BlockSpec((1, kh, Cin, mt), lambda b, m: (b, 0, 0, m)),
            w_spec,
            pl.BlockSpec((N, 1), lambda b, m: (0, 0)),
        ],
        out_specs=pl.BlockSpec((1, N, mt), lambda b, m: (b, 0, m)),
        compiler_params=pltpu.CompilerParams(
            dimension_semantics=("parallel", "parallel"),
            vmem_limit_bytes=vmem_limit),
    )(xs, w2, b2)

    # Drop the (kw-1) garbage tail columns per row, then the sub-pixel width
    # shuffle.  Batch-major kernel output -> no NCHW transpose left; XLA fuses
    # the slice + shuffle into a single copy.
    # TODO(synk): fold the r-interleave into the kernel's lane axis (weights
    # reordered (Cout, r)) to remove this last copy of the output as well.
    conv = out_flat.reshape(B, N, Ho, W_pad)[..., :Wo]
    out = conv.reshape(B, r, N // r, Ho, Wo).transpose(0, 2, 3, 4, 1)
    return out.reshape(B, N // r, Ho, Wo * r)


# ---------------------------------------------------------------------------
# Pure-JAX reference (XLA conv) for the correctness checks.
# ---------------------------------------------------------------------------
def sp_conv_transpose2d_ref(x, weight, bias, r):
    x_pad = jnp.pad(x, ((0, 0), (0, 0), (0, 0), (1, 1)))
    conv = jax.lax.conv_general_dilated(
        x_pad, weight, window_strides=(1, 1), padding="VALID",
        dimension_numbers=("NCHW", "OIHW", "NCHW"),
        precision=jax.lax.Precision.HIGHEST)
    conv = conv + bias.reshape(1, -1, 1, 1)
    B, N, Ho, Wo = conv.shape
    out = conv.reshape(B, r, N // r, Ho, Wo).transpose(0, 2, 3, 4, 1)
    return out.reshape(B, N // r, Ho, Wo * r)


def _run_case(key, *, B, Cin, Cout, r, kh, kw, H, W, tol, **kwargs):
    kx, kwt, kb = jax.random.split(key, 3)
    x = jax.random.normal(kx, (B, Cin, H, W), dtype=jnp.float32)
    weight = 0.3 * jax.random.normal(kwt, (Cout * r, Cin, kh, kw), dtype=jnp.float32)
    bias = 0.1 * jax.random.normal(kb, (Cout * r,), dtype=jnp.float32)

    fwd = jax.jit(functools.partial(sp_conv_transpose2d, r=r, **kwargs))
    out = jax.block_until_ready(fwd(x, weight, bias))
    ref = jax.block_until_ready(sp_conv_transpose2d_ref(x, weight, bias, r))

    Ho, Wo = H - kh + 1, (W + 2) - kw + 1
    assert out.shape == (B, Cout, Ho, Wo * r), (out.shape, (B, Cout, Ho, Wo * r))
    out32 = jnp.asarray(out, jnp.float32)
    assert bool(jnp.all(jnp.isfinite(out32)))
    err = float(jnp.max(jnp.abs(out32 - ref)))
    assert err <= tol, (err, tol)


if __name__ == "__main__":
    k1, k2, k3 = jax.random.split(jax.random.PRNGKey(0), 3)

    # MossFormer-GAN style usage (kernel_size=(1,3), r=2) — exact float32 path.
    _run_case(k1, B=2, Cin=16, Cout=8, r=2, kh=1, kw=3, H=16, W=9, tol=3e-2,
              compute_dtype=jnp.float32, out_dtype=jnp.float32)
    # Default fast path: bf16 operand/output streams, fused kw contraction.
    _run_case(k2, B=2, Cin=16, Cout=8, r=2, kh=1, kw=3, H=16, W=9, tol=1e-1)
    # Generality: kh>1, sublane-unaligned Cin (per-tap fallback), B=1 grid.
    _run_case(k3, B=1, Cin=4, Cout=4, r=2, kh=2, kw=3, H=12, W=10, tol=1e-1)

    print("KERNEL_OK")
</pallas_src>

<mosaic_0001>
module attributes {stable_mosaic.version = 11 : i64} {
  func.func @_spconv_kernel(%arg0: i32, %arg1: i32, %arg2: memref<1x1x16x176xf32, #tpu.memory_space<vmem>>, %arg3: memref<1x16x48xf32, #tpu.memory_space<vmem>>, %arg4: memref<16x1xf32, #tpu.memory_space<vmem>>, %arg5: memref<1x16x176xf32, #tpu.memory_space<vmem>>) attributes {dimension_semantics = [#tpu.dimension_semantics<parallel>, #tpu.dimension_semantics<parallel>], iteration_bounds = array<i64: 2, 1>, scalar_prefetch = 0 : i64, scratch_operands = 0 : i64, tpu.core_type = #tpu.core_type<tc>, window_params = [{transform_indices = @transform_0, window_bounds = array<i64: 1, 1, 16, 176>}, {pipeline_mode = #tpu.pipeline_mode<synchronous>, transform_indices = @transform_1, window_bounds = array<i64: 1, 16, 48>}, {pipeline_mode = #tpu.pipeline_mode<synchronous>, transform_indices = @transform_2, window_bounds = array<i64: 16, 1>}, {transform_indices = @transform_3, window_bounds = array<i64: 1, 16, 176>}]} {
    %c0 = arith.constant 0 : index
    %c0_0 = arith.constant 0 : index
    %0 = vector.load %arg4[%c0, %c0_0] : memref<16x1xf32, #tpu.memory_space<vmem>>, vector<16x1xf32>
    %c0_1 = arith.constant 0 : index
    %c0_2 = arith.constant 0 : index
    %c0_3 = arith.constant 0 : index
    %c0_4 = arith.constant 0 : index
    %1 = vector.load %arg2[%c0_1, %c0_2, %c0_3, %c0_4] : memref<1x1x16x176xf32, #tpu.memory_space<vmem>>, vector<1x1x16x176xf32>
    %2 = vector.shape_cast %1 : vector<1x1x16x176xf32> to vector<16x176xf32>
    %c175_i32 = arith.constant 175 : i32
    %3 = tpu.dynamic_rotate %2 by %c175_i32 dim 1 : vector<16x176xf32>, i32 -> vector<16x176xf32>
    %c174_i32 = arith.constant 174 : i32
    %4 = tpu.dynamic_rotate %2 by %c174_i32 dim 1 : vector<16x176xf32>, i32 -> vector<16x176xf32>
    %5 = tpu.concatenate %2, %3, %4 in 0 : vector<16x176xf32>, vector<16x176xf32>, vector<16x176xf32> -> vector<48x176xf32>
    %c0_5 = arith.constant 0 : index
    %c0_6 = arith.constant 0 : index
    %c0_7 = arith.constant 0 : index
    %6 = vector.load %arg3[%c0_5, %c0_6, %c0_7] : memref<1x16x48xf32, #tpu.memory_space<vmem>>, vector<1x16x48xf32>
    %7 = vector.shape_cast %6 : vector<1x16x48xf32> to vector<16x48xf32>
    %cst = arith.constant dense<0.000000e+00> : vector<16x176xf32>
    %8 = tpu.matmul %7, %5, %cst {dimension_numbers = #tpu.dot_dimension_numbers<[1], [0], [0], [1], [0, 0, 1, 1], [], []>} : vector<16x48xf32>, vector<48x176xf32>, vector<16x176xf32> -> vector<16x176xf32>
    %9 = vector.broadcast %0 : vector<16x1xf32> to vector<16x176xf32>
    %10 = arith.addf %8, %9 : vector<16x176xf32>
    %c0_8 = arith.constant 0 : index
    %c0_9 = arith.constant 0 : index
    %c0_10 = arith.constant 0 : index
    %11 = vector.load %arg5[%c0_8, %c0_9, %c0_10] : memref<1x16x176xf32, #tpu.memory_space<vmem>>, vector<1x16x176xf32>
    %12 = vector.shape_cast %11 : vector<1x16x176xf32> to vector<16x176xf32>
    %13 = vector.shape_cast %10 : vector<16x176xf32> to vector<1x16x176xf32>
    tpu.vector_store %arg5[%c0_8, %c0_9, %c0_10], %13 {strides = array<i32>} : memref<1x16x176xf32, #tpu.memory_space<vmem>>, vector<1x16x176xf32>,
    return
  }
  func.func @transform_0(%arg0: i32, %arg1: i32) -> (i32, i32, i32, i32) {
    %c0_i32 = arith.constant 0 : i32
    %c0_i32_0 = arith.constant 0 : i32
    %c0_i32_1 = arith.constant 0 : i32
    return %arg0, %c0_i32, %c0_i32_0, %arg1 : i32, i32, i32, i32
  }
  func.func @transform_1(%arg0: i32, %arg1: i32) -> (i32, i32, i32) {
    %c0_i32 = arith.constant 0 : i32
    %c0_i32_0 = arith.constant 0 : i32
    %c0_i32_1 = arith.constant 0 : i32
    %c0_i32_2 = arith.constant 0 : i32
    return %c0_i32, %c0_i32_0, %c0_i32_1 : i32, i32, i32
  }
  func.func @transform_2(%arg0: i32, %arg1: i32) -> (i32, i32) {
    %c0_i32 = arith.constant 0 : i32
    %c0_i32_0 = arith.constant 0 : i32
    %c0_i32_1 = arith.constant 0 : i32
    return %c0_i32, %c0_i32_0 : i32, i32
  }
  func.func @transform_3(%arg0: i32, %arg1: i32) -> (i32, i32, i32) {
    %c0_i32 = arith.constant 0 : i32
    %c0_i32_0 = arith.constant 0 : i32
    return %arg0, %c0_i32, %arg1 : i32, i32, i32
  }
}

</mosaic_0001>

<bundles_post_ra>
// kernel: sp_conv_transpose2d.1
= control target key start
LH: loop header
LB: loop body
LE: loop exit
PB: predicated region body
PF: predicated region fallthrough
CT: control target
= control target key end

     0   :  { %s551_s12 = smov 0   ;;  %s553_s13 = smov 0   ;;  %s621_s0 = inlined_call_operand.vmem [shape: f32[2,1,16,176], index: 0, kind: input, shape index: {}]   ;;  %s622_s1 = inlined_call_operand.vmem [shape: f32[1,16,48], index: 1, kind: input, shape index: {}]   ;;  %s623_s2 = inlined_call_operand.vmem [shape: f32[16,1], index: 2, kind: input, shape index: {}]   ;;  %s624_s3 = inlined_call_operand.vmem [shape: f32[2,16,176], index: 3, kind: output, shape index: {}]  }
   0x1   :  { %s555_s14 = smov 0  }
   0x2 LB: > { %s25_s15 = sadd.s32 1, %s520_s13  ;;  %p448_p0 = scmp.ge.s32.totalorder %s524_s14, 1  ;;  %s524_s14 = sphi %s555_s14, %s13_s14   ;;  %s520_s13 = sphi %s553_s13, %s626_s13   ;;  %s516_s12 = sphi %s551_s12, %s625_s12  }
   0x3   : > { %p27_p1 = scmp.ge.s32.totalorder %s25_s15, 2  ;;  %p158_p2 = scmp.lt.s32.totalorder %s524_s14, 3 }
   0x5   : > { %s628_s15 = smov (%p27_p1, %s25_s15), 0  ;;  %p159_p3 = pnand %p448_p0, %p158_p2 }
   0x6   : > { %p191_p4 = scmp.lt.s32.totalorder (!%p159_p3), %s516_s12, 1  ;;  %s526_s20 = smov (!%p159_p3), 48  }
   0x7   : > { %162 = sbr.rel (%p159_p3) target bundleno = 463 (0x1cf), region = 32  ;;  %s527_s21 = smov (!%p159_p3), 126  }
   0x8   : > { %s528_s22 = smov (!%p159_p3), 127  }
   0xc   : > { %s630_s12 = smov (!%p191_p4, %s516_s12), 1  ;;  %vm216_vm0 = vcmask 1047936   ;;  %v529_v8 = vmov 0.0   ;;  %v210_v9 = vld [vmem:[%s623_s2] sm:$0xff]  ;;  %v530_v10 = vmov 0   ;;  %v211_v11 = vld [vmem:[%s623_s2 + $0x8] sm:$0xff] }
   0xd   : > { %s457_s16 = sshll.u32 %s630_s12, 5  ;;  %340 = vmatprep.mubr.f32.mxu0 %v529_v8  ;;  %346 = vmatprep.mubr.f32.mxu1 %v529_v8  ;;  %vm250_vm1 = vcmask 1031168   ;;  %vm235_vm2 = vcmask 1039360   ;;  %v257_v24 = vld [vmem:[%s622_s1] sm:$0xff]  ;;  %vm269_vm3 = vcmask 392192   ;;  %v258_v25 = vld [vmem:[%s622_s1 + $0x8] sm:$0xff] }
   0xe   : > { %s198_s19 = scalar_lea.vmem %s621_s0, %s457_s16  ;;  %501 = vset.pattern.permute.xlu1 %v530_v10  ;;  %500 = vset.pattern.permute.xlu0 %v530_v10  ;;  %s208_s6 = scalar_lea.vmem %s624_s3, %s457_s16 }
   0xf   : > { %v577_v0 = vld [vmem:[%s198_s19 + $0x10] sm:$0xff]  ;;  %v581_v1 = vld [vmem:[%s198_s19] sm:$0xff]  ;;  %v215_v2 = vld [vmem:[%s198_s19 + $0x18] sm:$0xff] }
  0x10   : > { %219 = vrot.lane.b32.xlu0 %v577_v0, %s526_s20  ;;  %246 = vrot.lane.b32.xlu1 %v577_v0, %s527_s21  ;;  %v213_v5 = vld [vmem:[%s198_s19 + $0x8] sm:$0xff] }
  0x14   : > { %217 = vrot.lane.b32.xlu0 %v581_v1, %s526_s20 }
  0x18   : > { %242 = vrot.lane.b32.xlu0 %v581_v1, %s527_s21 }
  0x1c   : > { %231 = vrot.lane.b32.xlu0 %v577_v0, %s528_s22 }
  0x20   : > { %227 = vrot.lane.b32.xlu0 %v581_v1, %s528_s22 }
  0x24   : > { %261 = vperm.xlu0 %500, %v210_v9  }
  0x82   : > { %v220_v3 = vpop.permute.xlu0 %219  ;;  %v247_v12 = vpop.permute.xlu1 %246 }
  0x83   : > { %v222_v4 = vsel %vm216_vm0, %v220_v3, %v215_v2 }
  0x84   : > { %248 = vrot.lane.b32.xlu1 %v222_v4, %s527_s21 }
  0x86   : > { %v218_v6 = vpop.permute.xlu0 %217 }
  0x87   : > { %v221_v7 = vsel %vm216_vm0, %v218_v6, %v213_v5 }
  0x88   : > { %244 = vrot.lane.b32.xlu1 %v221_v7, %s527_s21 }
  0x8a   : > { %v243_v13 = vpop.permute.xlu0 %242 }
  0x8c   : > { %233 = vrot.lane.b32.xlu1 %v222_v4, %s528_s22 }
  0x8e   : > { %v232_v17 = vpop.permute.xlu0 %231 }
  0x90   : > { %229 = vrot.lane.b32.xlu1 %v221_v7, %s528_s22 }
  0x92   : > { %v228_v21 = vpop.permute.xlu0 %227 }
  0x94   : > { %266 = vperm.xlu1 %501, %v211_v11  }
  0x9f   : > { %v262_v27 = vpop.permute.xlu0 %261 }
  0xf6   : > { %v249_v14 = vpop.permute.xlu1 %248 }
  0xf7   : > { %296 = vmatprep.subr.mxu0 %v249_v14  ;;  %459 = vmatprep.subr.mxu1 %v249_v14  ;;  %v252_v15 = vsel %vm250_vm1, %v247_v12, %v249_v14 }
  0xf8   : > { %297 = vmatpush1.msra.mxu0 %v252_v15  ;;  %465 = vmatpush1.msra.mxu1 %v252_v15 }
  0xfa   : > { %v245_v16 = vpop.permute.xlu1 %244 }
  0xfb   : > { %298 = vmatprep.subr.mxu0 %v245_v16  ;;  %460 = vmatprep.subr.mxu1 %v245_v16  ;;  %v251_v18 = vsel %vm250_vm1, %v243_v13, %v245_v16 }
  0xfc   : > { %299 = vmatpush1.msra.mxu0 %v251_v18  ;;  %466 = vmatpush1.msra.mxu1 %v251_v18 }
  0xfe   : > { %v234_v19 = vpop.permute.xlu1 %233 }
  0xff   : > { %300 = vmatprep.subr.mxu0 %v234_v19  ;;  %461 = vmatprep.subr.mxu1 %v234_v19  ;;  %v237_v20 = vsel %vm235_vm2, %v232_v17, %v234_v19 }
 0x100   : > { %301 = vmatpush1.msra.mxu0 %v237_v20  ;;  %467 = vmatpush1.msra.mxu1 %v237_v20 }
 0x102   : > { %v230_v22 = vpop.permute.xlu1 %229 }
 0x103   : > { %302 = vmatprep.subr.mxu0 %v230_v22  ;;  %462 = vmatprep.subr.mxu1 %v230_v22  ;;  %v236_v23 = vsel %vm235_vm2, %v228_v21, %v230_v22 }
 0x104   : > { %303 = vmatpush1.msra.mxu0 %v236_v23  ;;  %468 = vmatpush1.msra.mxu1 %v236_v23 }
 0x105   : > { %304 = vmatprep.subr.mxu0 %v215_v2  ;;  %463 = vmatprep.subr.mxu1 %v215_v2 }
 0x106   : > { %305 = vmatpush1.msra.mxu0 %v577_v0  ;;  %469 = vmatpush1.msra.mxu1 %v577_v0 }
 0x107   : > { %306 = vmatprep.subr.mxu0 %v213_v5  ;;  %464 = vmatprep.subr.mxu1 %v213_v5 }
 0x108   : > { %307 = vmatpush1.msra.mxu0 %v581_v1  ;;  %470 = vmatpush1.msra.mxu1 %v581_v1 }
 0x109   : > { %453 = vmatmul.mubr.msk.f32.vlgmr.msra.gmra.mxu0 %vm269_vm3, %v257_v24  ;;  %454 = vmatmul.mubr.msk.f32.vlgmr.msra.gmra.mxu1 %vm269_vm3, %v258_v25 }
 0x10f   : > { %v267_v26 = vpop.permute.xlu1 %266 }
 0x1c9   : > { %v342_v28 = vpop.f32.mrf.mxu0  ;;  %v348_v29 = vpop.f32.mrf.mxu1 }
 0x1ca   : > { %v349_v30 = vadd.f32 %v348_v29, %v267_v26  ;;  %v343_v31 = vadd.f32 %v342_v28, %v262_v27 }
 0x1cb   : > { %v344_v32 = vpop.f32.mrf.mxu0  ;;  %v350_v33 = vpop.f32.mrf.mxu1 }
 0x1cc   : > { %355 = vst [vmem:[%s208_s6 + $0x10] sm:$0xff] %v349_v30  ;;  %353 = vst [vmem:[%s208_s6] sm:$0xff] %v343_v31  ;;  %v345_v34 = vadd.f32 %v344_v32, %v262_v27  ;;  %v351_v35 = vadd.f32 %v350_v33, %v267_v26 }
 0x1ce   : > { %354 = vst.msk [vmem:[%s208_s6 + $0x8] sm:$0xff] %vm269_vm3, %v345_v34  ;;  %356 = vst.msk [vmem:[%s208_s6 + $0x18] sm:$0xff] %vm269_vm3, %v351_v35 }
 0x1cf PF: > { %s13_s14 = sadd.s32 1, %s524_s14   ;;  %s625_s12 = smov %s520_s13 }
 0x1d0   : > { %p10_p5 = scmp.ge.s32.totalorder %s13_s14, 4   ;;  %s626_s13 = smov %s628_s15 }
 0x1d2   :  { %12 = sbr.rel (!%p10_p5) target bundleno = 2 (0x2), region = 62 }

</bundles_post_ra>
